<compile_context>
chip_gen: v6e
topology: v6e:2x2x1
jax: 0.10.0
libtpu: 0.0.40
codegen_flags: <defaults>
</compile_context>

<pallas_src>
import jax
import jax.numpy as jnp
from jax.experimental import pallas as pl
from jax.experimental.pallas import tpu as pltpu

_LANE = 128      # vreg lane width
_SUBLANE = 8     # vreg sublane count (f32)


def _round_up(x, m):
    return (x + m - 1) // m * m


def fc_decoder_kernel(z_ref, w_ref, b_ref, o_ref):
    """recon = sigmoid(z @ W + b), contraction unrolled as VPU broadcast FMAs.

    z_ref: (TB, K)   w_ref: (K, N)   b_ref: (1, N)   o_ref: (TB, N)
    K is a small compile-time constant (latent dim = 2), so a static unroll of
    broadcast multiply-adds beats pushing a K=2 contraction through the MXU.
    """
    z = z_ref[...]
    w = w_ref[...]
    k_dim = z.shape[1]
    # (TB,1) * (1,N) broadcasts: pure VALU work, no MXU.
    logits = z[:, 0:1] * w[0:1, :] + b_ref[...]
    for kk in range(1, k_dim):          # static unroll; K known at trace time
        logits = logits + z[:, kk:kk + 1] * w[kk:kk + 1, :]
    # sigmoid(x) = 0.5*tanh(0.5*x) + 0.5 : tanh lowers to the EUP (its own
    # bundle slot), keeping VALU ops/element low in this HBM-write-bound
    # kernel, while matching jax.nn.sigmoid to ~1 ulp in f32.
    o_ref[...] = (0.5 * jnp.tanh(0.5 * logits) + 0.5).astype(o_ref.dtype)


def prepare_decoder_params(weight, bias, dtype=jnp.float32):
    """One-time parameter prep, done OUTSIDE the per-call path.

    Takes the PyTorch-layout weight (N, K) and bias (N,), returns the weight
    pre-transposed to (K, N) and the bias as (1, N).  No lane padding: the
    kernel writes the true N directly (full-array last dim is a legal block).
    """
    n, k = weight.shape
    w_t = weight.T.astype(dtype)               # (K, N)
    b2 = bias.astype(dtype).reshape(1, n)      # (1, N)
    return w_t, b2


def fc_decoder(z, w_t, b2, *, block_b=2048, gridless_b=256,
               out_dtype=jnp.float32):
    """z: (B, K); w_t: (K, N) pre-transposed; b2: (1, N)."""
    b, k = z.shape
    k_w, n = w_t.shape
    assert k == k_w, "latent dim mismatch"

    out_itemsize = jnp.dtype(out_dtype).itemsize
    cost = pl.CostEstimate(
        flops=2 * k * b * n,
        transcendentals=b * n,
        bytes_accessed=b * n * out_itemsize + b * k * 4 + k * n * 4 + n * 4,
    )

    # Pad batch only to a sublane multiple (padded rows are sliced off below).
    b_pad = _round_up(max(b, _SUBLANE), _SUBLANE)

    if b_pad <= gridless_b:
        # --- small-batch path: gridless whole-array call, everything in VMEM ---
        z_p = z if b_pad == b else jnp.zeros((b_pad, k), z.dtype).at[:b, :].set(z)
        out = pl.pallas_call(
            fc_decoder_kernel,
            out_shape=jax.ShapeDtypeStruct((b_pad, n), out_dtype),
            in_specs=[
                pl.BlockSpec(memory_space=pltpu.MemorySpace.VMEM),
                pl.BlockSpec(memory_space=pltpu.MemorySpace.VMEM),
                pl.BlockSpec(memory_space=pltpu.MemorySpace.VMEM),
            ],
            out_specs=pl.BlockSpec(memory_space=pltpu.MemorySpace.VMEM),
            cost_estimate=cost,
        )(z_p, w_t, b2)
    else:
        # --- large-batch path: tile only over B, "parallel" grid axis ---
        # At least 2 steps so both v7x TensorCores get a block; tile size
        # derived from the real batch so padding is at most a few sublanes
        # per step, never up to block_b-8 rows.
        n_steps = max(2, pl.cdiv(b_pad, block_b))
        tb = _round_up(pl.cdiv(b_pad, n_steps), _SUBLANE)
        b_pad = tb * n_steps
        z_p = z if b_pad == b else jnp.zeros((b_pad, k), z.dtype).at[:b, :].set(z)

        # Explicit VMEM budget: double-buffered output + (lane-padded) z tiles
        # plus the resident weight/bias, with headroom.  Safe on v5e (16 MiB
        # default scoped limit) and below v7x's 64 MiB physical VMEM.
        out_bytes = tb * n * out_itemsize
        z_bytes = tb * _LANE * 4               # (tb, 2) lane-pads to (tb, 128)
        wb_bytes = (k + 1) * _round_up(n, _LANE) * 4
        vmem_need = 2 * (out_bytes + z_bytes) + wb_bytes
        vmem_limit = min(_round_up(vmem_need + (4 << 20), 1 << 20), 48 << 20)

        out = pl.pallas_call(
            fc_decoder_kernel,
            out_shape=jax.ShapeDtypeStruct((b_pad, n), out_dtype),
            grid=(n_steps,),
            in_specs=[
                pl.BlockSpec((tb, k), lambda i: (i, 0)),
                pl.BlockSpec((k, n), lambda i: (0, 0)),
                pl.BlockSpec((1, n), lambda i: (0, 0)),
            ],
            out_specs=pl.BlockSpec((tb, n), lambda i: (i, 0)),
            compiler_params=pltpu.CompilerParams(
                dimension_semantics=("parallel",),
                vmem_limit_bytes=vmem_limit),
            cost_estimate=cost,
        )(z_p, w_t, b2)

    # Output already has the true feature width N; only strip batch padding
    # (and only when padding was actually added).
    return out if b_pad == b else out[:b, :]


if __name__ == "__main__":
    # Small shapes consistent with the module: latent dim = 2, img_size = 784.
    batch = 8
    input_size = 2
    img_size = 784

    key = jax.random.PRNGKey(0)
    k_z, k_w, k_b = jax.random.split(key, 3)

    # Deterministic synthetic params mimicking nn.Linear default init:
    # U(-1/sqrt(fan_in), 1/sqrt(fan_in)).
    bound = 1.0 / jnp.sqrt(jnp.float32(input_size))
    weight = jax.random.uniform(
        k_w, (img_size, input_size), dtype=jnp.float32, minval=-bound, maxval=bound
    )
    bias = jax.random.uniform(
        k_b, (img_size,), dtype=jnp.float32, minval=-bound, maxval=bound
    )
    z = jax.random.normal(k_z, (batch, input_size), dtype=jnp.float32)

    # One-time parameter prep (transpose) outside the call path.
    w_t, b2 = prepare_decoder_params(weight, bias)

    out = fc_decoder(z, w_t, b2)
    out = jax.block_until_ready(out)

    # Reference check in plain JAX (same math as the PyTorch forward).
    ref = jax.nn.sigmoid(z @ weight.T + bias)
    assert out.shape == (batch, img_size)
    assert jnp.allclose(out, ref, atol=1e-5, rtol=1e-5)

    print("KERNEL_OK")
</pallas_src>

<mosaic_0001>
module attributes {stable_mosaic.version = 11 : i64} {
  func.func @fc_decoder_kernel(%arg0: memref<8x2xf32, #tpu.memory_space<vmem>>, %arg1: memref<2x784xf32, #tpu.memory_space<vmem>>, %arg2: memref<1x784xf32, #tpu.memory_space<vmem>>, %arg3: memref<8x784xf32, #tpu.memory_space<vmem>>) attributes {dimension_semantics = [], scalar_prefetch = 0 : i64, scratch_operands = 0 : i64, tpu.core_type = #tpu.core_type<tc>} {
    %c0 = arith.constant 0 : index
    %c0_0 = arith.constant 0 : index
    %0 = vector.load %arg0[%c0, %c0_0] : memref<8x2xf32, #tpu.memory_space<vmem>>, vector<8x2xf32>
    %c0_1 = arith.constant 0 : index
    %c0_2 = arith.constant 0 : index
    %1 = vector.load %arg1[%c0_1, %c0_2] : memref<2x784xf32, #tpu.memory_space<vmem>>, vector<2x784xf32>
    %2 = vector.extract_strided_slice %0 {offsets = [0, 0], sizes = [8, 1], strides = [1, 1]} : vector<8x2xf32> to vector<8x1xf32>
    %3 = vector.extract_strided_slice %1 {offsets = [0, 0], sizes = [1, 784], strides = [1, 1]} : vector<2x784xf32> to vector<1x784xf32>
    %4 = vector.broadcast %2 : vector<8x1xf32> to vector<8x784xf32>
    %5 = vector.broadcast %3 : vector<1x784xf32> to vector<8x784xf32>
    %6 = arith.mulf %4, %5 : vector<8x784xf32>
    %c0_3 = arith.constant 0 : index
    %c0_4 = arith.constant 0 : index
    %7 = vector.load %arg2[%c0_3, %c0_4] : memref<1x784xf32, #tpu.memory_space<vmem>>, vector<1x784xf32>
    %8 = vector.broadcast %7 : vector<1x784xf32> to vector<8x784xf32>
    %9 = arith.addf %6, %8 : vector<8x784xf32>
    %10 = vector.extract_strided_slice %0 {offsets = [0, 1], sizes = [8, 1], strides = [1, 1]} : vector<8x2xf32> to vector<8x1xf32>
    %11 = vector.extract_strided_slice %1 {offsets = [1, 0], sizes = [1, 784], strides = [1, 1]} : vector<2x784xf32> to vector<1x784xf32>
    %12 = vector.broadcast %10 : vector<8x1xf32> to vector<8x784xf32>
    %13 = vector.broadcast %11 : vector<1x784xf32> to vector<8x784xf32>
    %14 = arith.mulf %12, %13 : vector<8x784xf32>
    %15 = arith.addf %9, %14 : vector<8x784xf32>
    %cst = arith.constant 5.000000e-01 : f32
    %16 = vector.broadcast %cst : f32 to vector<8x784xf32>
    %17 = arith.mulf %16, %15 : vector<8x784xf32>
    %18 = math.tanh %17 : vector<8x784xf32>
    %cst_5 = arith.constant 5.000000e-01 : f32
    %19 = vector.broadcast %cst_5 : f32 to vector<8x784xf32>
    %20 = arith.mulf %19, %18 : vector<8x784xf32>
    %cst_6 = arith.constant 5.000000e-01 : f32
    %21 = vector.broadcast %cst_6 : f32 to vector<8x784xf32>
    %22 = arith.addf %20, %21 : vector<8x784xf32>
    %c0_7 = arith.constant 0 : index
    %c0_8 = arith.constant 0 : index
    %23 = vector.load %arg3[%c0_7, %c0_8] : memref<8x784xf32, #tpu.memory_space<vmem>>, vector<8x784xf32>
    tpu.vector_store %arg3[%c0_7, %c0_8], %22 {strides = array<i32>} : memref<8x784xf32, #tpu.memory_space<vmem>>, vector<8x784xf32>,
    return
  }
}

</mosaic_0001>

<bundles_post_ra>
// kernel: tpu_custom_call.1
= control target key start
LH: loop header
LB: loop body
LE: loop exit
PB: predicated region body
PF: predicated region fallthrough
CT: control target
= control target key end

     0   :  { %8 = vsyncpa [#allocation3], 0  ;;  %s383_s0 = inlined_call_operand.vmem [shape: f32[8,2], index: 0, kind: input, shape index: {}]   ;;  %s384_s1 = inlined_call_operand.hbm [shape: f32[2,784], index: 1, kind: input, shape index: {}]   ;;  %s385_s2 = inlined_call_operand.vmem [shape: f32[1,784], index: 2, kind: input, shape index: {}]   ;;  %s386_s3 = inlined_call_operand.hbm [shape: f32[8,784], index: 3, kind: output, shape index: {}]  }
   0x1   :  { %9 = vsyncpa [#allocation4], 0  ;;  %s347_s12 = smov [#allocation2]  }
   0x2   :  { %s18_s13 = sshll.u32 %s347_s12, 4  ;;  %s19_s13 = int_to_ptr.vmem [resolvable:$true] %s18_s13 }
   0x3   :  { %s311_s14 = scalar_lea.vmem %s19_s13, 224  ;;  %p316_p1 = scmp.lt.s32.totalorder %s19_s13, %s19_s13 }
   0x4   :  { %p312_p0 = scmp.ne.s32.totalorder %s19_s13, %s311_s14  ;;  %p317_p2 = scmp.lt.s32.totalorder %s311_s14, %s311_s14 }
   0x6   :  { %p318_p3 = por %p317_p2, %p316_p1 }
   0x8   :  { %p319_p4 = pnand %p318_p3, %p312_p0 }
   0xa   :  { %322 = shalt.err (!%p319_p4)
}
   0xb   :  { %21 = dma.hbm_to_vmem [thread:$0]  %s384_s1, 224, %s19_s13, [#allocation3]  }
   0xc   :  { %343 = dma.done.wait [#allocation3], 224  }
   0xd   :  { %344 = vsyncadd [#allocation3], 4294967072  ;;  %v348_v0 = vmov 0   ;;  %v27_v1 = vld [vmem:[%s383_s0] sm:$0xff]  ;;  %v349_v2 = vmov 1   ;;  %v37_v3 = vlaneseq  ;;  %s350_s0 = smov [#allocation5]  }
   0xe   :  { %287 = vset.pattern.permute.xlu0 %v348_v0  ;;  %v28_v7 = vld [vmem:[#allocation2] sm:$0xff]  ;;  %v29_v10 = vld [vmem:[#allocation2 + $0x8] sm:$0x3f]  ;;  %vm266_vm0 = vcmask 130048  }
   0xf   :  { %32 = vperm.xlu0 %287, %v27_v1   ;;  %v38_v4 = vshrl.u32 %v37_v3, 7  ;;  %v107_v15 = vld [vmem:[%s385_s2] sm:$0x7f]  ;;  %s274_s2 = sshll.u32 %s350_s0, 4  ;;  %s275_s2 = int_to_ptr.vmem [resolvable:$true] %s274_s2 }
  0x10   :  { %s323_s20 = scalar_lea.vmem %s275_s2, 896  ;;  %p328_p6 = scmp.lt.s32.totalorder %s275_s2, %s275_s2 }
  0x11   :  { %v39_v5 = vsub.s32 0, %v38_v4  ;;  %v43_v6 = vsub.s32 2, %v38_v4  ;;  %v47_v8 = vsub.s32 4, %v38_v4  ;;  %v51_v9 = vsub.s32 6, %v38_v4  ;;  %p324_p5 = scmp.ne.s32.totalorder %s275_s2, %s323_s20  ;;  %p329_p7 = scmp.lt.s32.totalorder %s323_s20, %s323_s20 }
  0x12   :  { %v115_v16 = vsub.s32 1, %v38_v4  ;;  %v123_v17 = vsub.s32 3, %v38_v4  ;;  %v131_v21 = vsub.s32 5, %v38_v4  ;;  %v169_v22 = vsub.s32 7, %v38_v4 }
  0x13   :  { %288 = vset.pattern.permute.xlu0 %v349_v2  ;;  %v40_v11 = vrot.slane %v28_v7, %v39_v5  ;;  %v44_v12 = vrot.slane %v28_v7, %v43_v6  ;;  %v48_v13 = vrot.slane %v28_v7, %v47_v8  ;;  %v52_v14 = vrot.slane %v28_v7, %v51_v9  ;;  %p330_p8 = por %p329_p7, %p328_p6 }
  0x14   :  { %152 = vperm.xlu0 %288, %v27_v1   ;;  %v56_v18 = vrot.slane %v29_v10, %v39_v5  ;;  %v60_v19 = vrot.slane %v29_v10, %v43_v6  ;;  %v64_v20 = vrot.slane %v29_v10, %v47_v8  ;;  %v112_v25 = vrot.slane %v107_v15, %v39_v5 }
  0x15   :  { %v75_v23 = vrot.slane %v40_v11, %v39_v5  ;;  %v79_v24 = vrot.slane %v44_v12, %v39_v5  ;;  %v83_v26 = vrot.slane %v48_v13, %v39_v5  ;;  %v87_v27 = vrot.slane %v52_v14, %v39_v5  ;;  %p331_p9 = pnand %p330_p8, %p324_p5 }
  0x16   :  { %v158_v28 = vrot.slane %v28_v7, %v115_v16  ;;  %v162_v29 = vrot.slane %v28_v7, %v123_v17  ;;  %v91_v30 = vrot.slane %v56_v18, %v39_v5  ;;  %v95_v31 = vrot.slane %v60_v19, %v39_v5 }
  0x17   :  { %v99_v32 = vrot.slane %v64_v20, %v39_v5  ;;  %v116_v33 = vrot.slane %v107_v15, %v115_v16  ;;  %v120_v34 = vrot.slane %v107_v15, %v43_v6  ;;  %v124_v35 = vrot.slane %v107_v15, %v123_v17 }
  0x18   :  { %v166_v36 = vrot.slane %v28_v7, %v131_v21  ;;  %v170_v37 = vrot.slane %v28_v7, %v169_v22  ;;  %v128_v38 = vrot.slane %v107_v15, %v47_v8  ;;  %v174_v39 = vrot.slane %v29_v10, %v115_v16 }
  0x19   :  { %v178_v40 = vrot.slane %v29_v10, %v123_v17  ;;  %v182_v41 = vrot.slane %v29_v10, %v131_v21  ;;  %v132_v43 = vrot.slane %v107_v15, %v131_v21  ;;  %v136_v44 = vrot.slane %v107_v15, %v51_v9 }
  0x1a   :  { %v193_v45 = vrot.slane %v158_v28, %v115_v16  ;;  %v197_v46 = vrot.slane %v162_v29, %v115_v16  ;;  %v201_v53 = vrot.slane %v166_v36, %v115_v16  ;;  %v205_v54 = vrot.slane %v170_v37, %v115_v16 }
  0x1b   :  { %v209_v56 = vrot.slane %v174_v39, %v115_v16  ;;  %v213_v57 = vrot.slane %v178_v40, %v115_v16  ;;  %v217_v58 = vrot.slane %v182_v41, %v115_v16 }
  0x8a   :  { %v33_v42 = vpop.permute.xlu0 %32 }
  0x8b   :  { %v100_v47 = vmul.f32 %v75_v23, %v33_v42  ;;  %v101_v48 = vmul.f32 %v79_v24, %v33_v42  ;;  %v102_v49 = vmul.f32 %v83_v26, %v33_v42  ;;  %v103_v50 = vmul.f32 %v87_v27, %v33_v42 }
  0x8c   :  { %v104_v51 = vmul.f32 %v91_v30, %v33_v42  ;;  %v105_v52 = vmul.f32 %v95_v31, %v33_v42  ;;  %v106_v55 = vmul.f32 %v99_v32, %v33_v42 }
  0x8d   :  { %v144_v59 = vadd.f32 %v112_v25, %v100_v47  ;;  %v145_v60 = vadd.f32 %v116_v33, %v101_v48  ;;  %v146_v61 = vadd.f32 %v120_v34, %v102_v49  ;;  %v147_v62 = vadd.f32 %v124_v35, %v103_v50 }
  0x8e   :  { %v148_v63 = vadd.f32 %v128_v38, %v104_v51  ;;  %v149_v0 = vadd.f32 %v132_v43, %v105_v52  ;;  %v150_v6 = vadd.f32 %v136_v44, %v106_v55 }
  0x8f   :  { %v153_v1 = vpop.permute.xlu0 %152 }
  0x90   :  { %v218_v2 = vmul.f32 %v193_v45, %v153_v1  ;;  %v219_v3 = vmul.f32 %v197_v46, %v153_v1  ;;  %v220_v4 = vmul.f32 %v201_v53, %v153_v1  ;;  %v221_v5 = vmul.f32 %v205_v54, %v153_v1 }
  0x91   :  { %v222_v7 = vmul.f32 %v209_v56, %v153_v1  ;;  %v223_v8 = vmul.f32 %v213_v57, %v153_v1  ;;  %v224_v9 = vmul.f32 %v217_v58, %v153_v1 }
  0x92   :  { %v225_v10 = vadd.f32 %v218_v2, %v144_v59  ;;  %v226_v11 = vadd.f32 %v219_v3, %v145_v60  ;;  %v227_v12 = vadd.f32 %v220_v4, %v146_v61  ;;  %v228_v13 = vadd.f32 %v221_v5, %v147_v62 }
  0x93   :  { %v229_v14 = vadd.f32 %v222_v7, %v148_v63  ;;  %v230_v15 = vadd.f32 %v223_v8, %v149_v0  ;;  %v231_v16 = vadd.f32 %v224_v9, %v150_v6 }
  0x94   :  { %v232_v17 = vmul.f32 0.5, %v225_v10  ;;  %v233_v18 = vmul.f32 0.5, %v226_v11  ;;  %v234_v19 = vmul.f32 0.5, %v227_v12  ;;  %v235_v20 = vmul.f32 0.5, %v228_v13 }
  0x95   :  { %v236_v21 = vmul.f32 0.5, %v229_v14  ;;  %v237_v22 = vmul.f32 0.5, %v230_v15  ;;  %v238_v23 = vmul.f32 0.5, %v231_v16 }
  0x96   :  { %289 = vtanh.f32 %v232_v17 }
  0x97   :  { %291 = vtanh.f32 %v233_v18 }
  0x98   :  { %293 = vtanh.f32 %v234_v19 }
  0x99   :  { %295 = vtanh.f32 %v235_v20 }
  0x9a   :  { %297 = vtanh.f32 %v236_v21 }
  0x9b   :  { %299 = vtanh.f32 %v237_v22 }
  0x9c   :  { %301 = vtanh.f32 %v238_v23 }
  0xa3   :  { %v290_v24 = vpop.eup %289 }
  0xa4   :  { %v292_v25 = vpop.eup %291  ;;  %v246_v26 = vmul.f32 0.5, %v290_v24 }
  0xa5   :  { %v294_v27 = vpop.eup %293  ;;  %v247_v28 = vmul.f32 0.5, %v292_v25 }
  0xa6   :  { %v296_v29 = vpop.eup %295  ;;  %v248_v30 = vmul.f32 0.5, %v294_v27  ;;  %v253_v31 = vadd.f32 0.5, %v246_v26 }
  0xa7   :  { %v298_v32 = vpop.eup %297  ;;  %v249_v33 = vmul.f32 0.5, %v296_v29  ;;  %v254_v34 = vadd.f32 0.5, %v247_v28 }
  0xa8   :  { %v300_v35 = vpop.eup %299  ;;  %v250_v36 = vmul.f32 0.5, %v298_v32  ;;  %v255_v37 = vadd.f32 0.5, %v248_v30  ;;  %260 = vst [vmem:[#allocation5] sm:$0xff] %v253_v31 }
  0xa9   :  { %v302_v38 = vpop.eup %301  ;;  %v251_v39 = vmul.f32 0.5, %v300_v35  ;;  %v256_v40 = vadd.f32 0.5, %v249_v33  ;;  %261 = vst [vmem:[#allocation5 + $0x8] sm:$0xff] %v254_v34 }
  0xaa   :  { %v252_v41 = vmul.f32 0.5, %v302_v38  ;;  %v257_v42 = vadd.f32 0.5, %v250_v36  ;;  %262 = vst [vmem:[#allocation5 + $0x10] sm:$0xff] %v255_v37 }
  0xab   :  { %v258_v43 = vadd.f32 0.5, %v251_v39  ;;  %263 = vst [vmem:[#allocation5 + $0x18] sm:$0xff] %v256_v40 }
  0xac   :  { %v259_v44 = vadd.f32 0.5, %v252_v41  ;;  %264 = vst [vmem:[#allocation5 + $0x20] sm:$0xff] %v257_v42 }
  0xad   :  { %265 = vst [vmem:[#allocation5 + $0x28] sm:$0xff] %v258_v43 }
  0xae   :  { %267 = vst.msk [vmem:[#allocation5 + $0x30] sm:$0xff] %vm266_vm0, %v259_v44 }
  0xaf   :  { %334 = shalt.err (!%p331_p9)
}
  0xb0   :  { %277 = dma.vmem_to_hbm [thread:$0]  %s275_s2, 896, %s386_s3, [#allocation4]  }
  0xb1   :  { %345 = dma.done.wait [#allocation4], 896  }
  0xb2   :  { %346 = vsyncadd [#allocation4], 4294966400 }
  0xb3   :  { %281 = vsyncpa [#allocation3], 1 }
  0xb4   :  { %282 = vsyncpa [#allocation4], 1 }

</bundles_post_ra>
